<compile_context>
chip_gen: v6e
topology: v6e:2x2x1
jax: 0.10.0
libtpu: 0.0.40
codegen_flags: <defaults>
</compile_context>

<pallas_src>
import numpy as np
import jax
import jax.numpy as jnp
from jax.experimental import pallas as pl
from jax.experimental.pallas import tpu as pltpu

# pywt 'db4' decomposition filters (deterministic, no pywt dependency).
DB4_DEC_LO = np.array(
    [-0.010597401784997278, 0.032883011666982945, 0.030841381835986965,
     -0.18703481171888114, -0.02798376941698385, 0.6308807679295904,
     0.7148465705525415, 0.23037781330885523], dtype=np.float64)
DB4_DEC_HI = np.array(
    [-0.23037781330885523, 0.7148465705525415, -0.6308807679295904,
     -0.02798376941698385, 0.18703481171888114, 0.030841381835986965,
     -0.032883011666982945, -0.010597401784997278], dtype=np.float64)

K = 8            # db4 filter length
PAD = K // 2     # conv1d padding
HALO = 128       # lane-aligned halo width (covers the K//2 - 1 = 3 extra taps)

# Taps as fed to F.conv1d (reversed decomposition filters), baked as Python
# float immediates so Mosaic folds them into vector constants (review opt #8).
LO_TAPS = tuple(float(v) for v in DB4_DEC_LO[::-1])
HI_TAPS = tuple(float(v) for v in DB4_DEC_HI[::-1])


def _round_up(a, b):
    return (a + b - 1) // b * b


def _dwt_kernel(x_ref, h_ref, ca_ref, cd_ref, buf_ref):
    # x_ref  : VMEM f32[2, rt, tt]        polyphase tile ([0]=even, [1]=odd)
    # h_ref  : VMEM f32[2, rt, 128]       halo: next 128 half-rate samples/phase
    # ca_ref : VMEM f32[rt, tt]           cA output tile
    # cd_ref : VMEM f32[rt, tt]           cD output tile
    # buf_ref: VMEM f32[2, rt, tt+128]    scratch = tile ++ halo (written once)
    tt = ca_ref.shape[-1]

    x_val = x_ref[...]                      # (2, rt, tt)
    buf_ref[:, :, :tt] = x_val              # dense, lane-aligned stores
    buf_ref[:, :, tt:] = h_ref[...]

    xe0 = x_val[0]
    xo0 = x_val[1]
    # m = 0 tap pair initialises the accumulators (no zeros + add).
    acc_a = LO_TAPS[0] * xe0 + LO_TAPS[1] * xo0
    acc_d = HI_TAPS[0] * xe0 + HI_TAPS[1] * xo0

    for m in range(1, K // 2):              # m = 1, 2, 3 — fully unrolled
        # One unaligned (lane offset m) window per shift, covering both phases;
        # the lane rotate goes to the XLU and the operand is reused by cA & cD.
        win = buf_ref[:, :, m:m + tt]       # (2, rt, tt)
        acc_a = acc_a + LO_TAPS[2 * m] * win[0] + LO_TAPS[2 * m + 1] * win[1]
        acc_d = acc_d + HI_TAPS[2 * m] * win[0] + HI_TAPS[2 * m + 1] * win[1]

    ca_ref[...] = acc_a
    cd_ref[...] = acc_d


def dwt1d(x, *, row_tile=64, time_tile=2048, vmem_limit_bytes=None):
    """x: f32[B, C, T]  ->  (cA, cD), each f32[B, C, (T + 2*PAD - K)//2 + 1]."""
    x = jnp.asarray(x, jnp.float32)
    B, C, T = x.shape

    if T < K:  # replicate-pad short sequences, as in the PyTorch module
        d = K - T
        x = jnp.pad(x, ((0, 0), (0, 0), (d // 2, d - d // 2)), mode="edge")
        T = x.shape[2]

    T_out = (T + 2 * PAD - K) // 2 + 1
    R = B * C

    # ---- tiling geometry (invariants enforced: rt % 8 == 0, tt % 128 == 0) ----
    rt = max(8, (row_tile // 8) * 8)
    tt = max(128, (time_tile // 128) * 128)
    rt = min(rt, _round_up(R, 8))
    tt = min(tt, _round_up(T_out, 128))
    n_r = pl.cdiv(R, rt)
    n_t = pl.cdiv(T_out, tt)
    # v7x has 2 TensorCores sharing HBM: give the 'parallel' grid >= 2 steps
    # whenever the problem can be split (neutral on v5e/v6e).
    if n_r * n_t < 2:
        if T_out > 128:
            tt = _round_up(pl.cdiv(T_out, 2), 128)
            n_t = pl.cdiv(T_out, tt)
        elif R > 8:
            rt = _round_up(pl.cdiv(R, 2), 8)
            n_r = pl.cdiv(R, rt)
    R_pad = n_r * rt                     # input rows padded so all blocks are in-bounds
    Th_alloc = n_t * tt + HALO           # half-rate length incl. halo region

    # ---- single fused pad + polyphase repack (one copy pass in XLA) ----------
    # x_poly[p, r, v] = x_zero_padded[r, 2*v + p]
    x2d = x.reshape(R, T)
    x_padded = jnp.pad(x2d, ((0, R_pad - R), (PAD, 2 * Th_alloc - PAD - T)))
    x_poly = x_padded.reshape(R_pad, Th_alloc, 2).transpose(2, 0, 1)  # (2, R_pad, Th_alloc)

    halo_blk = tt // 128  # halo block-index stride (halo block size is 128 lanes)

    cA2, cD2 = pl.pallas_call(
        _dwt_kernel,
        out_shape=(jax.ShapeDtypeStruct((R, T_out), jnp.float32),
                   jax.ShapeDtypeStruct((R, T_out), jnp.float32)),
        grid=(n_r, n_t),
        in_specs=[
            # main polyphase tile
            pl.BlockSpec((2, rt, tt), lambda i, j: (0, i, j)),
            # 128-wide lane-aligned halo right after the main tile
            pl.BlockSpec((2, rt, HALO), lambda i, j: (0, i, (j + 1) * halo_blk)),
        ],
        out_specs=(
            pl.BlockSpec((rt, tt), lambda i, j: (i, j)),
            pl.BlockSpec((rt, tt), lambda i, j: (i, j)),
        ),
        scratch_shapes=[pltpu.VMEM((2, rt, tt + HALO), jnp.float32)],
        compiler_params=pltpu.CompilerParams(
            dimension_semantics=("parallel", "parallel"),
            vmem_limit_bytes=vmem_limit_bytes),
    )(x_poly, x_poly)

    # Exact-shape outputs -> these reshapes are metadata-only (no copy).
    return cA2.reshape(B, C, T_out), cD2.reshape(B, C, T_out)


def _reference_numpy(x, dec_lo, dec_hi):
    """Direct NumPy replica of F.conv1d(stride=2, padding=K//2, groups=C)."""
    x = np.asarray(x, np.float64)
    B, C, T = x.shape
    k = len(dec_lo)
    pad = k // 2
    lo = np.asarray(dec_lo, np.float64)[::-1]
    hi = np.asarray(dec_hi, np.float64)[::-1]
    xp = np.pad(x, ((0, 0), (0, 0), (pad, pad)))
    t_out = (T + 2 * pad - k) // 2 + 1
    ca = np.zeros((B, C, t_out))
    cd = np.zeros((B, C, t_out))
    for t in range(t_out):
        win = xp[:, :, 2 * t:2 * t + k]
        ca[:, :, t] = np.einsum("bck,k->bc", win, lo)
        cd[:, :, t] = np.einsum("bck,k->bc", win, hi)
    return ca, cd


if __name__ == "__main__":
    dwt = jax.jit(dwt1d, static_argnames=("row_tile", "time_tile", "vmem_limit_bytes"))

    # Test 1: shapes implied by the module (B, C, T) = (2, 4, 16).
    B, C, T = 2, 4, 16
    x = jax.random.normal(jax.random.PRNGKey(0), (B, C, T), dtype=jnp.float32)
    cA, cD = jax.block_until_ready(dwt(x))
    ref_a, ref_d = _reference_numpy(np.asarray(x), DB4_DEC_LO, DB4_DEC_HI)
    assert cA.shape == (B, C, T // 2 + 1) and cD.shape == (B, C, T // 2 + 1)
    np.testing.assert_allclose(np.asarray(cA), ref_a, rtol=1e-5, atol=1e-5)
    np.testing.assert_allclose(np.asarray(cD), ref_d, rtol=1e-5, atol=1e-5)

    # Test 2: odd T, rows not a multiple of 8, multiple row/time tiles
    # (exercises the halo across a time-tile boundary + masked edge blocks).
    B2, C2, T2 = 3, 5, 301
    x2 = jax.random.normal(jax.random.PRNGKey(1), (B2, C2, T2), dtype=jnp.float32)
    cA2, cD2 = jax.block_until_ready(dwt(x2, row_tile=8, time_tile=128))
    ref_a2, ref_d2 = _reference_numpy(np.asarray(x2), DB4_DEC_LO, DB4_DEC_HI)
    np.testing.assert_allclose(np.asarray(cA2), ref_a2, rtol=1e-5, atol=1e-5)
    np.testing.assert_allclose(np.asarray(cD2), ref_d2, rtol=1e-5, atol=1e-5)

    print("KERNEL_OK")
</pallas_src>

<mosaic_0001>
module attributes {stable_mosaic.version = 11 : i64} {
  func.func @_dwt_kernel(%arg0: i32, %arg1: i32, %arg2: memref<2x8x128xf32, #tpu.memory_space<vmem>>, %arg3: memref<2x8x128xf32, #tpu.memory_space<vmem>>, %arg4: memref<8x128xf32, #tpu.memory_space<vmem>>, %arg5: memref<8x128xf32, #tpu.memory_space<vmem>>, %arg6: memref<2x8x256xf32, #tpu.memory_space<vmem>>) attributes {dimension_semantics = [#tpu.dimension_semantics<parallel>, #tpu.dimension_semantics<parallel>], iteration_bounds = array<i64: 1, 1>, scalar_prefetch = 0 : i64, scratch_operands = 1 : i64, tpu.core_type = #tpu.core_type<tc>, window_params = [{transform_indices = @transform_0, window_bounds = array<i64: 2, 8, 128>}, {transform_indices = @transform_1, window_bounds = array<i64: 2, 8, 128>}, {transform_indices = @transform_2, window_bounds = array<i64: 8, 128>}, {transform_indices = @transform_3, window_bounds = array<i64: 8, 128>}]} {
    %c0 = arith.constant 0 : index
    %c0_0 = arith.constant 0 : index
    %c0_1 = arith.constant 0 : index
    %0 = vector.load %arg2[%c0, %c0_0, %c0_1] : memref<2x8x128xf32, #tpu.memory_space<vmem>>, vector<2x8x128xf32>
    %c0_2 = arith.constant 0 : index
    %c0_3 = arith.constant 0 : index
    %c0_4 = arith.constant 0 : index
    %1 = vector.load %arg6[%c0_2, %c0_3, %c0_4] : memref<2x8x256xf32, #tpu.memory_space<vmem>>, vector<2x8x128xf32>
    tpu.vector_store %arg6[%c0_2, %c0_3, %c0_4], %0 {strides = array<i32>} : memref<2x8x256xf32, #tpu.memory_space<vmem>>, vector<2x8x128xf32>,
    %c0_5 = arith.constant 0 : index
    %c0_6 = arith.constant 0 : index
    %c0_7 = arith.constant 0 : index
    %2 = vector.load %arg3[%c0_5, %c0_6, %c0_7] : memref<2x8x128xf32, #tpu.memory_space<vmem>>, vector<2x8x128xf32>
    %c0_8 = arith.constant 0 : index
    %c0_9 = arith.constant 0 : index
    %c128 = arith.constant 128 : index
    %3 = vector.load %arg6[%c0_8, %c0_9, %c128] : memref<2x8x256xf32, #tpu.memory_space<vmem>>, vector<2x8x128xf32>
    tpu.vector_store %arg6[%c0_8, %c0_9, %c128], %2 {strides = array<i32>} : memref<2x8x256xf32, #tpu.memory_space<vmem>>, vector<2x8x128xf32>,
    %4 = vector.extract_strided_slice %0 {offsets = [0, 0, 0], sizes = [1, 8, 128], strides = [1, 1, 1]} : vector<2x8x128xf32> to vector<1x8x128xf32>
    %5 = vector.shape_cast %4 : vector<1x8x128xf32> to vector<8x128xf32>
    %6 = vector.extract_strided_slice %0 {offsets = [1, 0, 0], sizes = [1, 8, 128], strides = [1, 1, 1]} : vector<2x8x128xf32> to vector<1x8x128xf32>
    %7 = vector.shape_cast %6 : vector<1x8x128xf32> to vector<8x128xf32>
    %cst = arith.constant 0.230377808 : f32
    %8 = vector.broadcast %cst : f32 to vector<8x128xf32>
    %9 = arith.mulf %8, %5 : vector<8x128xf32>
    %cst_10 = arith.constant 0.714846551 : f32
    %10 = vector.broadcast %cst_10 : f32 to vector<8x128xf32>
    %11 = arith.mulf %10, %7 : vector<8x128xf32>
    %12 = arith.addf %9, %11 : vector<8x128xf32>
    %cst_11 = arith.constant -0.0105974022 : f32
    %13 = vector.broadcast %cst_11 : f32 to vector<8x128xf32>
    %14 = arith.mulf %13, %5 : vector<8x128xf32>
    %cst_12 = arith.constant -0.0328830108 : f32
    %15 = vector.broadcast %cst_12 : f32 to vector<8x128xf32>
    %16 = arith.mulf %15, %7 : vector<8x128xf32>
    %17 = arith.addf %14, %16 : vector<8x128xf32>
    %c0_13 = arith.constant 0 : index
    %c0_14 = arith.constant 0 : index
    %c1 = arith.constant 1 : index
    %18 = vector.load %arg6[%c0_13, %c0_14, %c1] : memref<2x8x256xf32, #tpu.memory_space<vmem>>, vector<2x8x128xf32>
    %19 = vector.extract_strided_slice %18 {offsets = [0, 0, 0], sizes = [1, 8, 128], strides = [1, 1, 1]} : vector<2x8x128xf32> to vector<1x8x128xf32>
    %20 = vector.shape_cast %19 : vector<1x8x128xf32> to vector<8x128xf32>
    %cst_15 = arith.constant 0.630880773 : f32
    %21 = vector.broadcast %cst_15 : f32 to vector<8x128xf32>
    %22 = arith.mulf %21, %20 : vector<8x128xf32>
    %23 = arith.addf %12, %22 : vector<8x128xf32>
    %24 = vector.extract_strided_slice %18 {offsets = [1, 0, 0], sizes = [1, 8, 128], strides = [1, 1, 1]} : vector<2x8x128xf32> to vector<1x8x128xf32>
    %25 = vector.shape_cast %24 : vector<1x8x128xf32> to vector<8x128xf32>
    %cst_16 = arith.constant -0.0279837698 : f32
    %26 = vector.broadcast %cst_16 : f32 to vector<8x128xf32>
    %27 = arith.mulf %26, %25 : vector<8x128xf32>
    %28 = arith.addf %23, %27 : vector<8x128xf32>
    %29 = vector.extract_strided_slice %18 {offsets = [0, 0, 0], sizes = [1, 8, 128], strides = [1, 1, 1]} : vector<2x8x128xf32> to vector<1x8x128xf32>
    %30 = vector.shape_cast %29 : vector<1x8x128xf32> to vector<8x128xf32>
    %cst_17 = arith.constant 0.0308413822 : f32
    %31 = vector.broadcast %cst_17 : f32 to vector<8x128xf32>
    %32 = arith.mulf %31, %30 : vector<8x128xf32>
    %33 = arith.addf %17, %32 : vector<8x128xf32>
    %34 = vector.extract_strided_slice %18 {offsets = [1, 0, 0], sizes = [1, 8, 128], strides = [1, 1, 1]} : vector<2x8x128xf32> to vector<1x8x128xf32>
    %35 = vector.shape_cast %34 : vector<1x8x128xf32> to vector<8x128xf32>
    %cst_18 = arith.constant 0.187034816 : f32
    %36 = vector.broadcast %cst_18 : f32 to vector<8x128xf32>
    %37 = arith.mulf %36, %35 : vector<8x128xf32>
    %38 = arith.addf %33, %37 : vector<8x128xf32>
    %c0_19 = arith.constant 0 : index
    %c0_20 = arith.constant 0 : index
    %c2 = arith.constant 2 : index
    %39 = vector.load %arg6[%c0_19, %c0_20, %c2] : memref<2x8x256xf32, #tpu.memory_space<vmem>>, vector<2x8x128xf32>
    %40 = vector.extract_strided_slice %39 {offsets = [0, 0, 0], sizes = [1, 8, 128], strides = [1, 1, 1]} : vector<2x8x128xf32> to vector<1x8x128xf32>
    %41 = vector.shape_cast %40 : vector<1x8x128xf32> to vector<8x128xf32>
    %cst_21 = arith.constant -0.187034816 : f32
    %42 = vector.broadcast %cst_21 : f32 to vector<8x128xf32>
    %43 = arith.mulf %42, %41 : vector<8x128xf32>
    %44 = arith.addf %28, %43 : vector<8x128xf32>
    %45 = vector.extract_strided_slice %39 {offsets = [1, 0, 0], sizes = [1, 8, 128], strides = [1, 1, 1]} : vector<2x8x128xf32> to vector<1x8x128xf32>
    %46 = vector.shape_cast %45 : vector<1x8x128xf32> to vector<8x128xf32>
    %cst_22 = arith.constant 0.0308413822 : f32
    %47 = vector.broadcast %cst_22 : f32 to vector<8x128xf32>
    %48 = arith.mulf %47, %46 : vector<8x128xf32>
    %49 = arith.addf %44, %48 : vector<8x128xf32>
    %50 = vector.extract_strided_slice %39 {offsets = [0, 0, 0], sizes = [1, 8, 128], strides = [1, 1, 1]} : vector<2x8x128xf32> to vector<1x8x128xf32>
    %51 = vector.shape_cast %50 : vector<1x8x128xf32> to vector<8x128xf32>
    %cst_23 = arith.constant -0.0279837698 : f32
    %52 = vector.broadcast %cst_23 : f32 to vector<8x128xf32>
    %53 = arith.mulf %52, %51 : vector<8x128xf32>
    %54 = arith.addf %38, %53 : vector<8x128xf32>
    %55 = vector.extract_strided_slice %39 {offsets = [1, 0, 0], sizes = [1, 8, 128], strides = [1, 1, 1]} : vector<2x8x128xf32> to vector<1x8x128xf32>
    %56 = vector.shape_cast %55 : vector<1x8x128xf32> to vector<8x128xf32>
    %cst_24 = arith.constant -0.630880773 : f32
    %57 = vector.broadcast %cst_24 : f32 to vector<8x128xf32>
    %58 = arith.mulf %57, %56 : vector<8x128xf32>
    %59 = arith.addf %54, %58 : vector<8x128xf32>
    %c0_25 = arith.constant 0 : index
    %c0_26 = arith.constant 0 : index
    %c3 = arith.constant 3 : index
    %60 = vector.load %arg6[%c0_25, %c0_26, %c3] : memref<2x8x256xf32, #tpu.memory_space<vmem>>, vector<2x8x128xf32>
    %61 = vector.extract_strided_slice %60 {offsets = [0, 0, 0], sizes = [1, 8, 128], strides = [1, 1, 1]} : vector<2x8x128xf32> to vector<1x8x128xf32>
    %62 = vector.shape_cast %61 : vector<1x8x128xf32> to vector<8x128xf32>
    %cst_27 = arith.constant 0.0328830108 : f32
    %63 = vector.broadcast %cst_27 : f32 to vector<8x128xf32>
    %64 = arith.mulf %63, %62 : vector<8x128xf32>
    %65 = arith.addf %49, %64 : vector<8x128xf32>
    %66 = vector.extract_strided_slice %60 {offsets = [1, 0, 0], sizes = [1, 8, 128], strides = [1, 1, 1]} : vector<2x8x128xf32> to vector<1x8x128xf32>
    %67 = vector.shape_cast %66 : vector<1x8x128xf32> to vector<8x128xf32>
    %cst_28 = arith.constant -0.0105974022 : f32
    %68 = vector.broadcast %cst_28 : f32 to vector<8x128xf32>
    %69 = arith.mulf %68, %67 : vector<8x128xf32>
    %70 = arith.addf %65, %69 : vector<8x128xf32>
    %71 = vector.extract_strided_slice %60 {offsets = [0, 0, 0], sizes = [1, 8, 128], strides = [1, 1, 1]} : vector<2x8x128xf32> to vector<1x8x128xf32>
    %72 = vector.shape_cast %71 : vector<1x8x128xf32> to vector<8x128xf32>
    %cst_29 = arith.constant 0.714846551 : f32
    %73 = vector.broadcast %cst_29 : f32 to vector<8x128xf32>
    %74 = arith.mulf %73, %72 : vector<8x128xf32>
    %75 = arith.addf %59, %74 : vector<8x128xf32>
    %76 = vector.extract_strided_slice %60 {offsets = [1, 0, 0], sizes = [1, 8, 128], strides = [1, 1, 1]} : vector<2x8x128xf32> to vector<1x8x128xf32>
    %77 = vector.shape_cast %76 : vector<1x8x128xf32> to vector<8x128xf32>
    %cst_30 = arith.constant -0.230377808 : f32
    %78 = vector.broadcast %cst_30 : f32 to vector<8x128xf32>
    %79 = arith.mulf %78, %77 : vector<8x128xf32>
    %80 = arith.addf %75, %79 : vector<8x128xf32>
    %c0_31 = arith.constant 0 : index
    %c0_32 = arith.constant 0 : index
    %81 = vector.load %arg4[%c0_31, %c0_32] : memref<8x128xf32, #tpu.memory_space<vmem>>, vector<8x128xf32>
    tpu.vector_store %arg4[%c0_31, %c0_32], %70 {strides = array<i32>} : memref<8x128xf32, #tpu.memory_space<vmem>>, vector<8x128xf32>,
    %c0_33 = arith.constant 0 : index
    %c0_34 = arith.constant 0 : index
    %82 = vector.load %arg5[%c0_33, %c0_34] : memref<8x128xf32, #tpu.memory_space<vmem>>, vector<8x128xf32>
    tpu.vector_store %arg5[%c0_33, %c0_34], %80 {strides = array<i32>} : memref<8x128xf32, #tpu.memory_space<vmem>>, vector<8x128xf32>,
    return
  }
  func.func @transform_0(%arg0: i32, %arg1: i32) -> (i32, i32, i32) {
    %c0_i32 = arith.constant 0 : i32
    %c0_i32_0 = arith.constant 0 : i32
    return %c0_i32, %arg0, %arg1 : i32, i32, i32
  }
  func.func @transform_1(%arg0: i32, %arg1: i32) -> (i32, i32, i32) {
    %c1_i32 = arith.constant 1 : i32
    %0 = arith.addi %arg1, %c1_i32 : i32
    %c1_i32_0 = arith.constant 1 : i32
    %1 = arith.muli %0, %c1_i32_0 : i32
    %c0_i32 = arith.constant 0 : i32
    %c0_i32_1 = arith.constant 0 : i32
    return %c0_i32, %arg0, %1 : i32, i32, i32
  }
  func.func @transform_2(%arg0: i32, %arg1: i32) -> (i32, i32) {
    %c0_i32 = arith.constant 0 : i32
    return %arg0, %arg1 : i32, i32
  }
  func.func @transform_3(%arg0: i32, %arg1: i32) -> (i32, i32) {
    %c0_i32 = arith.constant 0 : i32
    return %arg0, %arg1 : i32, i32
  }
}

</mosaic_0001>

<bundles_post_ra>
// kernel: dwt1d.1
= control target key start
LH: loop header
LB: loop body
LE: loop exit
PB: predicated region body
PF: predicated region fallthrough
CT: control target
= control target key end

     0   :  { %9 = vsyncpa [#allocation6], 0  ;;  %s340_s16 = smov 127   ;;  %s394_s0 = inlined_call_operand.vmem [shape: f32[2,8,256], index: 0, kind: input, shape index: {}, may-alias: {0,1}]   ;;  %s395_s1 = inlined_call_operand.vmem [shape: f32[2,8,256], index: 1, kind: input, shape index: {}, may-alias: {0,1}]   ;;  %s396_s2 = inlined_call_operand.hbm [shape: f32[8,9], index: 2, kind: output, shape index: {0}]   ;;  %s397_s3 = inlined_call_operand.hbm [shape: f32[8,9], index: 3, kind: output, shape index: {1}]  }
   0x1   :  { %v43_v0 = vld [vmem:[%s394_s0] sm:$0xff]  ;;  %v289_v1 = vld [vmem:[%s395_s1 + $0x8] sm:$0xff]  ;;  %v290_v6 = vld [vmem:[%s395_s1 + $0x18] sm:$0xff] }
   0x2   :  { %v138_v2 = vmul.f32 0.030841382, %v43_v0  ;;  %v115_v3 = vmul.f32 0.6308808, %v43_v0  ;;  %v139_v4 = vmul.f32 0.030841382, %v289_v1 }
   0x3   :  { %v116_v5 = vmul.f32 0.6308808, %v289_v1  ;;  %v45_v7 = vld [vmem:[%s394_s0 + $0x10] sm:$0xff]  ;;  %v128_v8 = vmul.f32 -0.02798377, %v290_v6 }
   0x4   :  { %142 = vrot.lane.b32.xlu1 %v138_v2, %s340_s16  ;;  %119 = vrot.lane.b32.xlu0 %v115_v3, %s340_s16  ;;  %v127_v9 = vmul.f32 -0.02798377, %v45_v7  ;;  %v109_v10 = vmul.f32 -0.03288301, %v45_v7  ;;  %v108_v11 = vmul.f32 -0.010597402, %v43_v0 }
   0x5   :  { %v106_v12 = vmul.f32 0.71484655, %v45_v7  ;;  %v105_v13 = vmul.f32 0.23037781, %v43_v0  ;;  %v150_v14 = vmul.f32 0.18703482, %v290_v6 }
   0x6   :  { %v149_v15 = vmul.f32 0.18703482, %v45_v7  ;;  %v377_v16 = vadd.f32 %v109_v10, %v108_v11 }
   0x8   :  { %144 = vrot.lane.b32.xlu1 %v139_v4, %s340_s16  ;;  %121 = vrot.lane.b32.xlu0 %v116_v5, %s340_s16 }
   0xc   :  { %133 = vrot.lane.b32.xlu1 %v128_v8, %s340_s16  ;;  %131 = vrot.lane.b32.xlu0 %v127_v9, %s340_s16 }
   0xd   :  { %10 = vsyncpa [#allocation8], 0  ;;  %v107_v17 = vadd.f32 %v106_v12, %v105_v13  ;;  %v161_v18 = vmul.f32 -0.18703482, %v289_v1  ;;  %v160_v19 = vmul.f32 -0.18703482, %v43_v0 }
   0xe   :  { %s341_s0 = smov 126   ;;  %v184_v20 = vmul.f32 -0.02798377, %v289_v1  ;;  %v183_v21 = vmul.f32 -0.02798377, %v43_v0  ;;  %s342_s1 = smov 125  }
   0xf   :  { %v173_v22 = vmul.f32 0.030841382, %v290_v6  ;;  %v172_v23 = vmul.f32 0.030841382, %v45_v7  ;;  %v195_v24 = vmul.f32 -0.6308808, %v290_v6 }
  0x10   :  { %155 = vrot.lane.b32.xlu1 %v150_v14, %s340_s16  ;;  %153 = vrot.lane.b32.xlu0 %v149_v15, %s340_s16  ;;  %v194_v25 = vmul.f32 -0.6308808, %v45_v7  ;;  %v206_v26 = vmul.f32 0.03288301, %v289_v1  ;;  %v205_v27 = vmul.f32 0.03288301, %v43_v0 }
  0x11   :  { %v229_v28 = vmul.f32 0.71484655, %v289_v1  ;;  %v228_v29 = vmul.f32 0.71484655, %v43_v0  ;;  %v218_v30 = vmul.f32 -0.010597402, %v290_v6 }
  0x12   :  { %v217_v31 = vmul.f32 -0.010597402, %v45_v7  ;;  %v240_v32 = vmul.f32 -0.23037781, %v290_v6  ;;  %v239_v33 = vmul.f32 -0.23037781, %v45_v7 }
  0x13   :  { %vm123_vm0 = vcmask 1039360   ;;  %vm168_vm1 = vcmask 1031168   ;;  %vm213_vm2 = vcmask 1022976   ;;  %s343_s21 = smov [#allocation5]   ;;  %s344_s23 = smov [#allocation7]  }
  0x14   :  { %166 = vrot.lane.b32.xlu1 %v161_v18, %s341_s0  ;;  %164 = vrot.lane.b32.xlu0 %v160_v19, %s341_s0  ;;  %s258_s22 = sshll.u32 %s343_s21, 4  ;;  %s268_s24 = sshll.u32 %s344_s23, 4  ;;  %s259_s22 = int_to_ptr.vmem [resolvable:$true] %s258_s22  ;;  %s269_s24 = int_to_ptr.vmem [resolvable:$true] %s268_s24 }
  0x15   :  { %s296_s25 = scalar_lea.vmem %s259_s22, 128  ;;  %p301_p1 = scmp.lt.s32.totalorder %s259_s22, %s259_s22 }
  0x16   :  { %p297_p0 = scmp.ne.s32.totalorder %s259_s22, %s296_s25  ;;  %p302_p2 = scmp.lt.s32.totalorder %s296_s25, %s296_s25 }
  0x18   :  { %189 = vrot.lane.b32.xlu1 %v184_v20, %s341_s0  ;;  %187 = vrot.lane.b32.xlu0 %v183_v21, %s341_s0  ;;  %p303_p3 = por %p302_p2, %p301_p1 }
  0x1a   :  { %p304_p4 = pnand %p303_p3, %p297_p0 }
  0x1c   :  { %178 = vrot.lane.b32.xlu1 %v173_v22, %s341_s0  ;;  %176 = vrot.lane.b32.xlu0 %v172_v23, %s341_s0 }
  0x20   :  { %200 = vrot.lane.b32.xlu1 %v195_v24, %s341_s0  ;;  %198 = vrot.lane.b32.xlu0 %v194_v25, %s341_s0 }
  0x24   :  { %211 = vrot.lane.b32.xlu1 %v206_v26, %s342_s1  ;;  %209 = vrot.lane.b32.xlu0 %v205_v27, %s342_s1 }
  0x28   :  { %234 = vrot.lane.b32.xlu1 %v229_v28, %s342_s1  ;;  %232 = vrot.lane.b32.xlu0 %v228_v29, %s342_s1 }
  0x2c   :  { %223 = vrot.lane.b32.xlu1 %v218_v30, %s342_s1  ;;  %221 = vrot.lane.b32.xlu0 %v217_v31, %s342_s1 }
  0x30   :  { %245 = vrot.lane.b32.xlu1 %v240_v32, %s342_s1  ;;  %243 = vrot.lane.b32.xlu0 %v239_v33, %s342_s1 }
  0x76   :  { %v143_v34 = vpop.permute.xlu1 %142  ;;  %v120_v35 = vpop.permute.xlu0 %119 }
  0x7a   :  { %v145_v36 = vpop.permute.xlu1 %144  ;;  %v122_v37 = vpop.permute.xlu0 %121 }
  0x7b   :  { %v124_v50 = vsel %vm123_vm0, %v120_v35, %v122_v37  ;;  %v146_v55 = vsel %vm123_vm0, %v143_v34, %v145_v36 }
  0x7c   :  { %v126_v52 = vadd.f32 %v124_v50, %v107_v17  ;;  %v148_v60 = vadd.f32 %v146_v55, %v377_v16 }
  0x7e   :  { %v134_v38 = vpop.permute.xlu1 %133  ;;  %v132_v39 = vpop.permute.xlu0 %131 }
  0x7f   :  { %v135_v51 = vsel %vm123_vm0, %v132_v39, %v134_v38 }
  0x80   :  { %v137_v57 = vadd.f32 %v135_v51, %v126_v52 }
  0x82   :  { %v156_v40 = vpop.permute.xlu1 %155  ;;  %v154_v41 = vpop.permute.xlu0 %153 }
  0x83   :  { %v157_v58 = vsel %vm123_vm0, %v154_v41, %v156_v40 }
  0x84   :  { %v159_v2 = vadd.f32 %v157_v58, %v148_v60 }
  0x86   :  { %v167_v42 = vpop.permute.xlu1 %166  ;;  %v165_v43 = vpop.permute.xlu0 %164 }
  0x87   :  { %v169_v56 = vsel %vm168_vm1, %v165_v43, %v167_v42 }
  0x88   :  { %v171_v61 = vadd.f32 %v169_v56, %v137_v57 }
  0x8a   :  { %v190_v44 = vpop.permute.xlu1 %189  ;;  %v188_v45 = vpop.permute.xlu0 %187 }
  0x8b   :  { %v191_v0 = vsel %vm168_vm1, %v188_v45, %v190_v44 }
  0x8c   :  { %v193_v5 = vadd.f32 %v191_v0, %v159_v2 }
  0x8e   :  { %v179_v46 = vpop.permute.xlu1 %178  ;;  %v177_v47 = vpop.permute.xlu0 %176 }
  0x8f   :  { %v180_v59 = vsel %vm168_vm1, %v177_v47, %v179_v46 }
  0x90   :  { %v182_v3 = vadd.f32 %v180_v59, %v171_v61 }
  0x92   :  { %v201_v48 = vpop.permute.xlu1 %200  ;;  %v199_v49 = vpop.permute.xlu0 %198 }
  0x93   :  { %v202_v4 = vsel %vm168_vm1, %v199_v49, %v201_v48 }
  0x94   :  { %v204_v11 = vadd.f32 %v202_v4, %v193_v5 }
  0x96   :  { %v212_v53 = vpop.permute.xlu1 %211  ;;  %v210_v54 = vpop.permute.xlu0 %209 }
  0x97   :  { %v214_v1 = vsel %vm213_vm2, %v210_v54, %v212_v53 }
  0x98   :  { %v216_v6 = vadd.f32 %v214_v1, %v182_v3 }
  0x9a   :  { %v235_v62 = vpop.permute.xlu1 %234  ;;  %v233_v63 = vpop.permute.xlu0 %232 }
  0x9b   :  { %v236_v9 = vsel %vm213_vm2, %v233_v63, %v235_v62 }
  0x9c   :  { %v238_v13 = vadd.f32 %v236_v9, %v204_v11 }
  0x9e   :  { %v224_v7 = vpop.permute.xlu1 %223  ;;  %v222_v8 = vpop.permute.xlu0 %221 }
  0x9f   :  { %v225_v10 = vsel %vm213_vm2, %v222_v8, %v224_v7 }
  0xa0   :  { %v227_v12 = vadd.f32 %v225_v10, %v216_v6 }
  0xa2   :  { %v246_v14 = vpop.permute.xlu1 %245  ;;  %v244_v15 = vpop.permute.xlu0 %243  ;;  %250 = vst [vmem:[#allocation5] sm:$0xff] %v227_v12 }
  0xa3   :  { %v247_v16 = vsel %vm213_vm2, %v244_v15, %v246_v14 }
  0xa4   :  { %307 = shalt.err (!%p304_p4)
}
  0xa5   :  { %261 = dma.vmem_to_hbm [thread:$0]  %s259_s22, 128, %s396_s2, [#allocation6]   ;;  %v249_v17 = vadd.f32 %v247_v16, %v238_v13 }
  0xa6   :  { %s316_s28 = scalar_lea.vmem %s269_s24, 128  ;;  %p321_p6 = scmp.lt.s32.totalorder %s269_s24, %s269_s24 }
  0xa7   :  { %251 = vst [vmem:[#allocation7] sm:$0xff] %v249_v17  ;;  %p317_p5 = scmp.ne.s32.totalorder %s269_s24, %s316_s28  ;;  %p322_p7 = scmp.lt.s32.totalorder %s316_s28, %s316_s28 }
  0xa9   :  { %p323_p8 = por %p322_p7, %p321_p6 }
  0xab   :  { %p324_p9 = pnand %p323_p8, %p317_p5 }
  0xad   :  { %327 = shalt.err (!%p324_p9)
}
  0xae   :  { %271 = dma.vmem_to_hbm [thread:$0]  %s269_s24, 128, %s397_s3, [#allocation8]  }
  0xaf   :  { %336 = dma.done.wait [#allocation6], 128  }
  0xb0   :  { %337 = vsyncadd [#allocation6], 4294967168 }
  0xb1   :  { %338 = dma.done.wait [#allocation8], 128  }
  0xb2   :  { %339 = vsyncadd [#allocation8], 4294967168 }
  0xb3   :  { %278 = vsyncpa [#allocation6], 1 }
  0xb4   :  { %279 = vsyncpa [#allocation8], 1 }

</bundles_post_ra>
